<compile_context>
chip_gen: v5e
topology: v5e:2x2
jax: 0.10.0
libtpu: 0.0.40
codegen_flags: <defaults>
</compile_context>

<pallas_src>
import functools

import jax
import jax.numpy as jnp
from jax.experimental import pallas as pl
from jax.experimental.pallas import tpu as pltpu


def _ssdeep_svdd_kernel(x_ref, known_ref, mu_ref, out_ref, *,
                        rows_in_last, ragged, tile_rows,
                        use_approx_recip, bf16_diff):
    """One row-tile: squared distance to mu, known/unknown loss, partial sum."""
    i = pl.program_id(0)

    mu = mu_ref[...]                                       # (1, D) f32, resident
    if bf16_diff and x_ref.dtype == jnp.bfloat16:
        # Flag-guarded (off by default): bf16 subtract on bf16-capable VPUs
        # (v6e/v7x); slightly lower-precision d2.
        diff = (x_ref[...] - mu.astype(jnp.bfloat16)).astype(jnp.float32)
    else:
        diff = x_ref[...].astype(jnp.float32) - mu         # (TM, D) f32
    d2 = jnp.sum(diff * diff, axis=-1, keepdims=True)      # (TM, 1)  XLU reduce

    known = known_ref[...].astype(jnp.int32) > 0           # (TM, 1)  is_known(y)
    # TODO(synk): reference module has no epsilon in 1/d2; an unknown sample exactly
    # at the center yields inf (and an inf mean), matching PyTorch — no silent eps.
    inv_d2 = pl.reciprocal(d2, approx=use_approx_recip)
    loss = jnp.where(known, d2, inv_d2)                    # (TM, 1) per-sample loss

    lane_ids = jax.lax.broadcasted_iota(jnp.int32, (1, 128), 1)

    def _write(partial):
        # Lane-dense (1, 128) output block: partial sum in lane 0, zeros elsewhere.
        out_ref[...] = jnp.where(lane_ids == 0, partial, 0.0)

    if ragged:
        last = pl.num_programs(0) - 1

        @pl.when(i != last)
        def _():
            _write(jnp.sum(loss))

        @pl.when(i == last)
        def _():
            # Only the last tile carries out-of-bounds garbage rows; select them out
            # (jnp.where is a lane select — garbage NaN/Inf is never read into the sum).
            row_ids = jax.lax.broadcasted_iota(jnp.int32, (tile_rows, 1), 0)
            _write(jnp.sum(jnp.where(row_ids < rows_in_last, loss, 0.0)))
    else:
        _write(jnp.sum(loss))


def _chip_config():
    """(vmem_limit_bytes or None, tile_budget_bytes, two_tensorcores_per_chip)."""
    kind = ""
    try:
        for dev in jax.devices():
            if dev.platform == "tpu":
                kind = dev.device_kind.lower()
                break
    except Exception:  # pragma: no cover - defensive, fall through to safe defaults
        pass
    mib = 1024 * 1024
    if "7" in kind:
        # v7x-class: only 64 MiB physical VMEM per TensorCore, 2 TCs per chip.
        # Stay at the 32 MiB scoped default and leave headroom.
        return 32 * mib, 24 * mib, True
    if "v4" in kind or "v5" in kind or "v6" in kind:
        # 128 MiB physical VMEM, single TensorCore per chip: raise the scoped limit.
        return 64 * mib, 56 * mib, False
    # Unknown chip: do not set a limit; fit under the smallest default (16 MiB).
    return None, 12 * mib, False


def _pick_tile_rows(n, d, itemsize, budget_bytes):
    """Largest row tile whose worst-case VMEM footprint fits the budget.

    Per-row charges (lane dim pads to 128 in VMEM):
      2 * d_lanes * itemsize   double-buffered native-dtype x tile
      12 * d_lanes             up to 3 full-tile f32 temporaries (upcast/diff/square)
      2 * 128                  (TM,1) int8 'known' block, lane-padded, double-buffered
      3072                     lane-sparse (TM,1) f32 epilogue temps (d2/1-d2/loss/...)
    """
    d_lanes = ((d + 127) // 128) * 128
    per_row = 2 * d_lanes * itemsize + 12 * d_lanes + 2 * 128 + 3072
    tm = budget_bytes // per_row
    tm = max(32, int(tm) - (int(tm) % 32))     # multiple of 32 (int8 sublane tiling)
    tm = min(tm, 32768)                        # sanity cap (never binds for real D)
    n8 = ((n + 7) // 8) * 8
    return min(tm, max(8, n8))


def ssdeep_svdd_loss(x, y, center, reduction="mean", *,
                     tile_rows=None, approx_reciprocal=False,
                     bf16_subtract=False, core_parallel=None):
    """Pallas wrapper mirroring SSDeepSVDDLoss.forward.

    x: (N, D) features (any float dtype — kept native for the HBM read);
    y: (N,) int labels (<0 == unknown/OOD); center: (D,) the fixed center mu.
    Only reduction='mean' (the module default) is implemented in-kernel.
    """
    assert reduction == "mean"  # TODO(synk): 'sum' / None reductions not wired up
    n, d = x.shape
    itemsize = jnp.dtype(x.dtype).itemsize

    vmem_limit, budget, two_tc = _chip_config()
    if tile_rows is None:
        tile_rows = _pick_tile_rows(n, d, itemsize, budget)
    assert tile_rows % 8 == 0, "tile_rows must be a multiple of 8 (sublane tiling)"
    grid = pl.cdiv(n, tile_rows)
    ragged = (n % tile_rows) != 0
    rows_in_last = n - (grid - 1) * tile_rows

    # Wrapper-side mask: 1 byte/row instead of a 4-byte label -> 4x less VMEM padding
    # for the (tile_rows, 1) block; the (N,)-sized XLA op is negligible next to x.
    known = (y >= 0).astype(jnp.int8).reshape(n, 1)
    mu = center.reshape(1, d).astype(jnp.float32)

    if core_parallel is None:
        core_parallel = two_tc and grid >= 2
    row_semantics = pltpu.CORE_PARALLEL if core_parallel else "parallel"

    kernel = functools.partial(
        _ssdeep_svdd_kernel,
        rows_in_last=rows_in_last, ragged=ragged, tile_rows=tile_rows,
        use_approx_recip=approx_reciprocal, bf16_diff=bf16_subtract)

    partials = pl.pallas_call(
        kernel,
        out_shape=jax.ShapeDtypeStruct((1, grid * 128), jnp.float32),
        grid=(grid,),
        in_specs=[
            pl.BlockSpec((tile_rows, d), lambda i: (i, 0)),   # x     : native-dtype row tile
            pl.BlockSpec((tile_rows, 1), lambda i: (i, 0)),   # known : int8 flag per row
            pl.BlockSpec((1, d), lambda i: (0, 0)),           # mu    : resident across grid
        ],
        out_specs=pl.BlockSpec((1, 128), lambda i: (0, i)),    # per-step partial sums
        compiler_params=pltpu.CompilerParams(
            dimension_semantics=(row_semantics,),
            vmem_limit_bytes=vmem_limit),
    )(x, known, mu)

    return jnp.sum(partials) / n


if __name__ == "__main__":
    key = jax.random.PRNGKey(0)
    kx, kc, kx2, kx3 = jax.random.split(key, 4)

    def ref_loss(x, y, center):
        xf = x.astype(jnp.float32)
        cf = center.astype(jnp.float32)
        d2 = jnp.sum((xf - cf[None, :]) ** 2, axis=-1)
        return jnp.mean(jnp.where(y >= 0, d2, 1.0 / d2))

    # Case 1: small (batch=8, n_features=32), f32, single full tile.
    N, D = 8, 32
    x = jax.random.normal(kx, (N, D), dtype=jnp.float32)
    y = jnp.array([0, 1, -1, 2, -1, 0, 3, -1], dtype=jnp.int32)  # mix of known / OOD
    center = 0.1 * jax.random.normal(kc, (D,), dtype=jnp.float32)
    out = ssdeep_svdd_loss(x, y, center)
    jax.block_until_ready(out)
    assert jnp.allclose(out, ref_loss(x, y, center), rtol=1e-5, atol=1e-5), (
        out, ref_loss(x, y, center))

    # Case 2: ragged N (203 rows, tile_rows=64 -> 4 grid steps, last tile masked),
    # exercises both the full-tile and the ragged-last-tile code paths.
    N2 = 203
    x2 = jax.random.normal(kx2, (N2, D), dtype=jnp.float32)
    y2 = jnp.where(jax.random.uniform(kx2, (N2,)) < 0.3, -1, 1).astype(jnp.int32)
    out2 = ssdeep_svdd_loss(x2, y2, center, tile_rows=64)
    jax.block_until_ready(out2)
    assert jnp.allclose(out2, ref_loss(x2, y2, center), rtol=1e-5, atol=1e-5), (
        out2, ref_loss(x2, y2, center))

    # Case 3: bf16 features read natively by the kernel (no wrapper-side f32 upcast).
    N3, D3 = 64, 128
    x3 = jax.random.normal(kx3, (N3, D3), dtype=jnp.bfloat16)
    y3 = jnp.where(jax.random.uniform(kx3, (N3,)) < 0.5, -1, 2).astype(jnp.int32)
    c3 = 0.1 * jax.random.normal(kc, (D3,), dtype=jnp.float32)
    out3 = ssdeep_svdd_loss(x3, y3, c3)
    jax.block_until_ready(out3)
    assert jnp.allclose(out3, ref_loss(x3, y3, c3), rtol=1e-4, atol=1e-4), (
        out3, ref_loss(x3, y3, c3))

    print("KERNEL_OK")
</pallas_src>

<mosaic_0001>
module attributes {stable_mosaic.version = 11 : i64} {
  func.func @_ssdeep_svdd_kernel(%arg0: i32, %arg1: memref<8x32xf32, #tpu.memory_space<vmem>>, %arg2: memref<8x1xi8, #tpu.memory_space<vmem>>, %arg3: memref<1x32xf32, #tpu.memory_space<vmem>>, %arg4: memref<1x128xf32, #tpu.memory_space<vmem>>) attributes {dimension_semantics = [#tpu.dimension_semantics<parallel>], iteration_bounds = array<i64: 1>, scalar_prefetch = 0 : i64, scratch_operands = 0 : i64, tpu.core_type = #tpu.core_type<tc>, window_params = [{transform_indices = @transform_0, window_bounds = array<i64: 8, 32>}, {transform_indices = @transform_1, window_bounds = array<i64: 8, 1>}, {pipeline_mode = #tpu.pipeline_mode<synchronous>, transform_indices = @transform_2, window_bounds = array<i64: 1, 32>}, {transform_indices = @transform_3, window_bounds = array<i64: 1, 128>}]} {
    %c0 = arith.constant 0 : index
    %c0_0 = arith.constant 0 : index
    %0 = vector.load %arg3[%c0, %c0_0] : memref<1x32xf32, #tpu.memory_space<vmem>>, vector<1x32xf32>
    %c0_1 = arith.constant 0 : index
    %c0_2 = arith.constant 0 : index
    %1 = vector.load %arg1[%c0_1, %c0_2] : memref<8x32xf32, #tpu.memory_space<vmem>>, vector<8x32xf32>
    %2 = vector.broadcast %0 : vector<1x32xf32> to vector<8x32xf32>
    %3 = arith.subf %1, %2 : vector<8x32xf32>
    %4 = arith.mulf %3, %3 : vector<8x32xf32>
    %cst = arith.constant dense<0.000000e+00> : vector<8xf32>
    %5 = vector.multi_reduction <add>, %4, %cst [1] : vector<8x32xf32> to vector<8xf32>
    %6 = vector.shape_cast %5 : vector<8xf32> to vector<8x1xf32>
    %c0_3 = arith.constant 0 : index
    %c0_4 = arith.constant 0 : index
    %7 = vector.load %arg2[%c0_3, %c0_4] : memref<8x1xi8, #tpu.memory_space<vmem>>, vector<8x1xi8>
    %8 = arith.extsi %7 : vector<8x1xi8> to vector<8x1xi32>
    %c0_i32 = arith.constant 0 : i32
    %9 = vector.broadcast %c0_i32 : i32 to vector<8x1xi32>
    %10 = arith.cmpi sgt, %8, %9 : vector<8x1xi32>
    %11 = tpu.reciprocal %6 : vector<8x1xf32> -> vector<8x1xf32>
    %12 = arith.select %10, %6, %11 : vector<8x1xi1>, vector<8x1xf32>
    %13 = tpu.iota {dimensions = array<i32: 1>} : vector<1x128xi32>
    %14 = vector.shape_cast %12 : vector<8x1xf32> to vector<1x8x1xf32>
    %cst_5 = arith.constant dense<0.000000e+00> : vector<1xf32>
    %15 = vector.multi_reduction <add>, %14, %cst_5 [1, 2] : vector<1x8x1xf32> to vector<1xf32>
    %16 = vector.shape_cast %15 : vector<1xf32> to vector<1x1x1xf32>
    %17 = vector.extract %16[0, 0, 0] : f32 from vector<1x1x1xf32>
    %c0_i32_6 = arith.constant 0 : i32
    %18 = vector.broadcast %c0_i32_6 : i32 to vector<1x128xi32>
    %19 = arith.cmpi eq, %13, %18 : vector<1x128xi32>
    %cst_7 = arith.constant 0.000000e+00 : f32
    %20 = vector.broadcast %17 : f32 to vector<1x128xf32>
    %21 = vector.broadcast %cst_7 : f32 to vector<1x128xf32>
    %22 = arith.select %19, %20, %21 : vector<1x128xi1>, vector<1x128xf32>
    %c0_8 = arith.constant 0 : index
    %c0_9 = arith.constant 0 : index
    %23 = vector.load %arg4[%c0_8, %c0_9] : memref<1x128xf32, #tpu.memory_space<vmem>>, vector<1x128xf32>
    tpu.vector_store %arg4[%c0_8, %c0_9], %22 {strides = array<i32>} : memref<1x128xf32, #tpu.memory_space<vmem>>, vector<1x128xf32>,
    return
  }
  func.func @transform_0(%arg0: i32) -> (i32, i32) {
    %c0_i32 = arith.constant 0 : i32
    %c0_i32_0 = arith.constant 0 : i32
    return %arg0, %c0_i32 : i32, i32
  }
  func.func @transform_1(%arg0: i32) -> (i32, i32) {
    %c0_i32 = arith.constant 0 : i32
    %c0_i32_0 = arith.constant 0 : i32
    return %arg0, %c0_i32 : i32, i32
  }
  func.func @transform_2(%arg0: i32) -> (i32, i32) {
    %c0_i32 = arith.constant 0 : i32
    %c0_i32_0 = arith.constant 0 : i32
    %c0_i32_1 = arith.constant 0 : i32
    return %c0_i32, %c0_i32_0 : i32, i32
  }
  func.func @transform_3(%arg0: i32) -> (i32, i32) {
    %c0_i32 = arith.constant 0 : i32
    %c0_i32_0 = arith.constant 0 : i32
    return %c0_i32, %arg0 : i32, i32
  }
}

</mosaic_0001>

<bundles_post_ra>
// kernel: tpu_custom_call.1
= control target key start
LH: loop header
LB: loop body
LE: loop exit
PB: predicated region body
PF: predicated region fallthrough
CT: control target
= control target key end

     0   :  { %8 = vsyncpa [#allocation3], 0  ;;  %s185_s0 = inlined_call_operand.hbm [shape: f32[8,32], index: 0, kind: input, shape index: {}]   ;;  %s186_s1 = inlined_call_operand.vmem [shape: s8[8,1], index: 1, kind: input, shape index: {}]   ;;  %s187_s2 = inlined_call_operand.vmem [shape: f32[1,32], index: 2, kind: input, shape index: {}]   ;;  %s188_s3 = inlined_call_operand.hbm [shape: f32[1,128], index: 3, kind: output, shape index: {}]  }
   0x1   :  { %9 = vsyncpa [#allocation4], 0  ;;  %s15_s14 = sshll.u32 %s185_s0, 4  ;;  %s151_s15 = smov [#allocation2]   ;;  %s16_s14 = int_to_ptr.hbm [resolvable:$true] %s15_s14 }
   0x2   :  { %s17_s16 = sshll.u32 %s151_s15, 4  ;;  %s18_s16 = int_to_ptr.vmem [resolvable:$true] %s17_s16 }
   0x3   :  { %20 = dma.hbm_to_vmem [thread:$0]  %s16_s14, 128, %s18_s16, [#allocation3]  }
   0x4   :  { %147 = dma.done.wait [#allocation3], 128  }
   0x5   :  { %148 = vsyncadd [#allocation3], 4294967168  ;;  %v30_v0 = vld [vmem:[#allocation2] sm:$0xff]  ;;  %vm36_vm0 = vcmask 261120   ;;  %vm60_vm6 = vcmask 7168   ;;  %v58_v27 = vlaneseq  ;;  %s82_s22 = sshll.u32 %s188_s3, 4  ;;  %s83_s22 = int_to_ptr.hbm [resolvable:$true] %s82_s22 }
   0x6   :  { %v96_v1 = vld [vmem:[%s187_s2] ss:$0 sm:$0xff] }
   0x7   :  { %v34_v2 = vsub.f32 %v30_v0, %v96_v1  ;;  %v40_v8 = vld [vmem:[%s186_s1] sm:$0x3]  ;;  %v59_v28 = vand.u32 127, %v58_v27  ;;  %s152_s1 = smov [#allocation5]  }
   0x8   :  { %v41_v10 = vunpack.c.0.s8 %v40_v8  ;;  %s80_s2 = sshll.u32 %s152_s1, 4  ;;  %s81_s2 = int_to_ptr.vmem [resolvable:$true] %s80_s2 }
   0x9   :  { %v35_v3 = vmul.f32 %v34_v2, %v34_v2  ;;  %vm71_vm7 = vcmp.eq.s32.totalorder %v59_v28, 0 }
   0xa   :  { %vm42_vm3 = vcmp.gt.s32.totalorder %v41_v10, 0 }
   0xb   :  { %v37_v4 = vsel %vm36_vm0, %v35_v3, 0.0 }
   0xc   :  { %38 = vadd.xlane.f32.xlu0 %v37_v4 }
  0x7f   :  { %v39_v5 = vpop.xlane.xlu0 %38 }
  0x80   :  { %97 = vrcp.f32 %v39_v5  ;;  %v54_v11 = vand.u32 2147483648, %v39_v5  ;;  %v52_v13 = vand.u32 2147483647, %v39_v5  ;;  %vm48_vm2 = vweird.f32 %v39_v5 }
  0x82   :  { %v55_v15 = vor.u32 1.1754944e-38, %v54_v11  ;;  %vm53_vm5 = vcmp.eq.f32.partialorder %v52_v13, 8.507059e+37 }
  0x86   :  { %v98_v6 = vpop.eup %97 }
  0x87   :  { %v44_v7 = vmul.f32 %v98_v6, %v39_v5  ;;  %vm49_vm1 = vweird.f32 %v98_v6 }
  0x88   :  { %vm50_vm4 = vmor %vm48_vm2, %vm49_vm1 }
  0x89   :  { %v45_v9 = vsub.f32 1.0, %v44_v7 }
  0x8b   :  { %v46_v12 = vmul.f32 %v98_v6, %v45_v9 }
  0x8d   :  { %v47_v14 = vadd.f32 %v98_v6, %v46_v12 }
  0x8f   :  { %v51_v16 = vsel %vm50_vm4, %v98_v6, %v47_v14 }
  0x90   :  { %v56_v17 = vsel %vm53_vm5, %v55_v15, %v51_v16 }
  0x91   :  { %v57_v18 = vsel %vm42_vm3, %v39_v5, %v56_v17 }
  0x92   :  { %v61_v19 = vsel %vm60_vm6, %v57_v18, 0.0 }
  0x93   :  { %62 = vadd.xlane.f32.xlu0 %v61_v19 }
 0x106   :  { %v63_v20 = vpop.xlane.xlu0 %62 }
 0x107   :  { %v64_v21 = vrot.slane %v63_v20, 4 }
 0x109   :  { %v65_v22 = vadd.f32 %v64_v21, %v63_v20 }
 0x10b   :  { %v66_v23 = vrot.slane %v65_v22, 2 }
 0x10d   :  { %v67_v24 = vadd.f32 %v66_v23, %v65_v22 }
 0x10f   :  { %v68_v25 = vrot.slane %v67_v24, 1 }
 0x111   :  { %v69_v26 = vadd.f32 %v68_v25, %v67_v24 }
 0x113   :  { %92 = vpush %v69_v26 }
 0x144   :  { %s93_s23 = spop %92 }
 0x145   :  { %v72_v29 = vstv %s93_s23 }
 0x146   :  { %v73_v30 = vsel %vm71_vm7, %v72_v29, 0.0 }
 0x147   :  { %74 = vst [vmem:[#allocation5] sm:$0x1] %v73_v30 }
 0x148   :  { %85 = dma.vmem_to_hbm [thread:$0]  %s81_s2, 16, %s83_s22, [#allocation4]  }
 0x149   :  { %149 = dma.done.wait [#allocation4], 16  }
 0x14a   :  { %150 = vsyncadd [#allocation4], 4294967280 }
 0x14b   :  { %90 = vsyncpa [#allocation3], 1 }
 0x14c   :  { %91 = vsyncpa [#allocation4], 1 }

</bundles_post_ra>
